<compile_context>
chip_gen: v5e
topology: v5e:2x2
jax: 0.10.0
libtpu: 0.0.40
codegen_flags: <defaults>
</compile_context>

<pallas_src>
import jax
import jax.numpy as jnp
from jax.experimental import pallas as pl
from jax.experimental.pallas import tpu as pltpu


def linreg_kernel(wb_ref, x_ref, o_ref):
    # wb_ref: (2,) f32 in SMEM via scalar prefetch -> [weight, bias]
    w = wb_ref[0]
    b = wb_ref[1]
    o_ref[...] = (x_ref[...].astype(jnp.float32) * w + b).astype(o_ref.dtype)


def linear_regression(x: jax.Array, weight: jax.Array, bias: jax.Array) -> jax.Array:
    """y = weight * x + bias  (scalar weight / bias, elementwise over any shape)."""
    orig_shape = x.shape
    orig_dtype = x.dtype
    n = int(x.size)

    LANE = 128
    # Lane-dense layout: wide last dim (multiple of 128).
    cols = 2048 if n >= 2048 else LANE * pl.cdiv(max(n, 1), LANE)
    rows = pl.cdiv(max(n, 1), cols)

    # Row tile sized to ~2 MiB per block (multiple of 8 sublanes), so
    # double-buffered input + output stays well under scoped VMEM on
    # v5e/v6e/v7x while still amortizing per-step pipeline overhead.
    itemsize = jnp.dtype(orig_dtype).itemsize
    bytes_per_row = cols * itemsize
    tr = max(8, min(rows, (2 * 1024 * 1024) // bytes_per_row))
    tr = max(8, (tr // 8) * 8)
    if rows < tr:
        tr = rows  # single short tile: full-extent block dim is allowed
    grid = pl.cdiv(rows, tr)
    rows_padded = grid * tr

    # Pad the flattened data into the (rows_padded, cols) slab.
    x_flat = x.reshape(-1)
    pad = rows_padded * cols - n
    if pad:
        x_flat = jnp.pad(x_flat, (0, pad))
    x2d = x_flat.reshape(rows_padded, cols)

    # Pack scalar params for scalar prefetch (lands in SMEM).
    wb = jnp.stack([weight.reshape(()), bias.reshape(())]).astype(jnp.float32)

    y2d = pl.pallas_call(
        linreg_kernel,
        out_shape=jax.ShapeDtypeStruct((rows_padded, cols), orig_dtype),
        grid_spec=pltpu.PrefetchScalarGridSpec(
            num_scalar_prefetch=1,
            grid=(grid,),
            in_specs=[
                pl.BlockSpec((tr, cols), lambda i, wb_ref: (i, 0)),  # x tile
            ],
            out_specs=pl.BlockSpec((tr, cols), lambda i, wb_ref: (i, 0)),
        ),
        compiler_params=pltpu.CompilerParams(
            dimension_semantics=("parallel",),
            vmem_limit_bytes=32 * 1024 * 1024,
        ),
    )(wb, x2d)

    return y2d.reshape(-1)[:n].reshape(orig_shape)


if __name__ == "__main__":
    key = jax.random.PRNGKey(0)
    kw, kb, kx, kx2 = jax.random.split(key, 4)

    # Deterministic "randn"-style parameter init (module __init__: randn(1), randn(1)).
    weight = jax.random.normal(kw, (1,), dtype=jnp.float32)
    bias = jax.random.normal(kb, (1,), dtype=jnp.float32)

    # Small input consistent with the forward (elementwise over any shape).
    x = jax.random.normal(kx, (16, 128), dtype=jnp.float32)
    y = jax.block_until_ready(linear_regression(x, weight, bias))
    y_ref = weight[0] * x + bias[0]
    assert jnp.allclose(y, y_ref, atol=1e-6, rtol=1e-6), "mismatch vs reference"

    # Second check: non-(8,128)-aligned shape exercises the pad/reshape path.
    x_odd = jax.random.normal(kx2, (7, 33), dtype=jnp.float32)
    y_odd = jax.block_until_ready(linear_regression(x_odd, weight, bias))
    y_odd_ref = weight[0] * x_odd + bias[0]
    assert jnp.allclose(y_odd, y_odd_ref, atol=1e-6, rtol=1e-6), "mismatch (odd shape)"

    print("KERNEL_OK")
</pallas_src>

<mosaic_0001>
module attributes {stable_mosaic.version = 11 : i64} {
  func.func @linreg_kernel(%arg0: i32, %arg1: memref<2xf32, #tpu.memory_space<smem>>, %arg2: memref<1x2048xf32, #tpu.memory_space<vmem>>, %arg3: memref<1x2048xf32, #tpu.memory_space<vmem>>) attributes {dimension_semantics = [#tpu.dimension_semantics<parallel>], iteration_bounds = array<i64: 1>, scalar_prefetch = 1 : i64, scratch_operands = 0 : i64, tpu.core_type = #tpu.core_type<tc>, window_params = [{transform_indices = @transform_0, window_bounds = array<i64: 1, 2048>}, {transform_indices = @transform_1, window_bounds = array<i64: 1, 2048>}]} {
    %c0 = arith.constant 0 : index
    %0 = memref.load %arg1[%c0] : memref<2xf32, #tpu.memory_space<smem>>
    %c1 = arith.constant 1 : index
    %1 = memref.load %arg1[%c1] : memref<2xf32, #tpu.memory_space<smem>>
    %c0_0 = arith.constant 0 : index
    %c0_1 = arith.constant 0 : index
    %2 = vector.load %arg2[%c0_0, %c0_1] : memref<1x2048xf32, #tpu.memory_space<vmem>>, vector<1x2048xf32>
    %3 = vector.broadcast %0 : f32 to vector<1x2048xf32>
    %4 = arith.mulf %2, %3 : vector<1x2048xf32>
    %5 = vector.broadcast %1 : f32 to vector<1x2048xf32>
    %6 = arith.addf %4, %5 : vector<1x2048xf32>
    %c0_2 = arith.constant 0 : index
    %c0_3 = arith.constant 0 : index
    %7 = vector.load %arg3[%c0_2, %c0_3] : memref<1x2048xf32, #tpu.memory_space<vmem>>, vector<1x2048xf32>
    tpu.vector_store %arg3[%c0_2, %c0_3], %6 {strides = array<i32>} : memref<1x2048xf32, #tpu.memory_space<vmem>>, vector<1x2048xf32>,
    return
  }
  func.func @transform_0(%arg0: i32, %arg1: memref<2xf32, #tpu.memory_space<smem>>) -> (i32, i32) {
    %c0_i32 = arith.constant 0 : i32
    %c0_i32_0 = arith.constant 0 : i32
    return %arg0, %c0_i32 : i32, i32
  }
  func.func @transform_1(%arg0: i32, %arg1: memref<2xf32, #tpu.memory_space<smem>>) -> (i32, i32) {
    %c0_i32 = arith.constant 0 : i32
    %c0_i32_0 = arith.constant 0 : i32
    return %arg0, %c0_i32 : i32, i32
  }
}

</mosaic_0001>

<bundles_post_ra>
// kernel: tpu_custom_call.1
= control target key start
LH: loop header
LB: loop body
LE: loop exit
PB: predicated region body
PF: predicated region fallthrough
CT: control target
= control target key end

     0   :  { %s131_s12 = smov [#allocation3]   ;;  %s158_s0 = inlined_call_operand.hbm [shape: f32[2], index: 0, kind: input, shape index: {}]   ;;  %s159_s1 = inlined_call_operand.hbm [shape: f32[1,2048], index: 1, kind: input, shape index: {}]   ;;  %s160_s2 = inlined_call_operand.hbm [shape: f32[1,2048], index: 2, kind: output, shape index: {}]  }
   0x1   :  { %s8_s11 = sshll.u32 %s158_s0, 4  ;;  %s9_s11 = int_to_ptr.hbm [resolvable:$true] %s8_s11 }
   0x2   :  { %11 = dma.hbm_to_smem %s9_s11, 16, %s131_s12, [#allocation2] }
   0x3   :  { %125 = dma.done.wait [#allocation2], 16 }
   0x4   :  { %126 = vsyncadd [#allocation2], 4294967280 }
   0x5   :  { %14 = sfence }
   0x6   :  { %15 = vsyncpa [#allocation5], 0 }
   0x7   :  { %16 = vsyncpa [#allocation6], 0  ;;  %s22_s15 = sshll.u32 %s159_s1, 4  ;;  %s132_s16 = smov [#allocation4]   ;;  %s23_s15 = int_to_ptr.hbm [resolvable:$true] %s22_s15 }
   0x8   :  { %s24_s17 = sshll.u32 %s132_s16, 4  ;;  %s25_s17 = int_to_ptr.vmem [resolvable:$true] %s24_s17 }
   0x9   :  { %27 = dma.hbm_to_vmem [thread:$0]  %s23_s15, 256, %s25_s17, [#allocation5]  }
   0xa   :  { %127 = dma.done.wait [#allocation5], 256  }
   0xb   :  { %128 = vsyncadd [#allocation5], 4294967040  ;;  %s32_s0 = sld [smem:[#allocation3]]  ;;  %v34_v0 = vld [vmem:[#allocation4] sm:$0xff]  ;;  %v35_v2 = vld [vmem:[#allocation4 + $0x8] sm:$0xff]  ;;  %s133_s19 = smov [#allocation7]  }
   0xc   :  { %s61_s18 = sld [smem:[#allocation3 + $0x1]]  ;;  %s49_s20 = sshll.u32 %s133_s19, 4  ;;  %s50_s20 = int_to_ptr.vmem [resolvable:$true] %s49_s20 }
   0xd   :  { %s51_s1 = sshll.u32 %s160_s2, 4  ;;  %s52_s1 = int_to_ptr.hbm [resolvable:$true] %s51_s1 }
  0x11   :  { %v36_v1 = vstv %s32_s0 }
  0x12   :  { %v37_v3 = vmul.f32 %v36_v1, %v34_v0  ;;  %v39_v4 = vstv %s61_s18  ;;  %v38_v5 = vmul.f32 %v36_v1, %v35_v2 }
  0x14   :  { %v40_v6 = vadd.f32 %v39_v4, %v37_v3  ;;  %v41_v7 = vadd.f32 %v39_v4, %v38_v5 }
  0x16   :  { %42 = vst [vmem:[#allocation7] sm:$0xff] %v40_v6 }
  0x17   :  { %43 = vst [vmem:[#allocation7 + $0x8] sm:$0xff] %v41_v7 }
  0x18   :  { %54 = dma.vmem_to_hbm [thread:$0]  %s50_s20, 256, %s52_s1, [#allocation6]  }
  0x19   :  { %129 = dma.done.wait [#allocation6], 256  }
  0x1a   :  { %130 = vsyncadd [#allocation6], 4294967040 }
  0x1b   :  { %59 = vsyncpa [#allocation5], 1 }
  0x1c   :  { %60 = vsyncpa [#allocation6], 1 }

</bundles_post_ra>
